<compile_context>
chip_gen: v7x
topology: tpu7x:2x2x1
jax: 0.10.0
libtpu: 0.0.40
codegen_flags: <defaults>
</compile_context>

<pallas_src>
import functools

import jax
import jax.numpy as jnp
from jax import lax
from jax.experimental import pallas as pl
from jax.experimental.pallas import tpu as pltpu

T1 = 5.0
T2 = 10.0
TD = (T2 ** 2 - T1 ** 2) / T2 ** 2

# Statistic indices in the (5, 8, D) accumulator / per-partial output slab.
_SUM, _SUMSQ, _MIN, _MAX, _NOTOH = 0, 1, 2, 3, 4


def _round_up(v, m):
    return ((v + m - 1) // m) * m


def _tpu_generation_params():
    """Generation-aware knobs.

    Returns (vmem_limit_bytes, stats_tile_budget_bytes, norm_tile_budget_bytes,
    num_stat_partials).  Tile budgets are denominated in f32 bytes (the in-kernel
    intermediates are f32 regardless of the input dtype).  Defaults are the safe
    single-TensorCore / 128 MiB-VMEM settings.
    """
    kind = ""
    try:
        kind = jax.devices()[0].device_kind.lower()
    except Exception:
        pass
    if "v7" in kind:
        # 64 MiB VMEM per TensorCore, 2 TCs per chip -> tighter caps, 2 partials.
        return 48 * 2 ** 20, 4 * 2 ** 20, 6 * 2 ** 20, 2
    if "v2" in kind or "v3" in kind:
        # 16 MiB VMEM per core; each JAX device is a single TensorCore.
        return 12 * 2 ** 20, 1 * 2 ** 20, 1 * 2 ** 20, 1
    if "v4" in kind or "v5p" in kind:
        # Megacore generations with 128 MiB VMEM.
        return 96 * 2 ** 20, 6 * 2 ** 20, 10 * 2 ** 20, 2
    # v5e / v6e (single TensorCore, 128 MiB VMEM) and the safe default.
    return 96 * 2 ** 20, 6 * 2 ** 20, 10 * 2 ** 20, 1


def _sublane_multiple(dtype):
    """Packed-sublane row granularity: f32 -> 8, bf16 -> 16, int8/fp8 -> 32."""
    return max(8, 32 // jnp.dtype(dtype).itemsize)


def _choose_tile_rows(n_rows, d, budget_bytes, sublane_mult):
    """Rows per tile: as many as the (f32-denominated) budget allows, rounded to
    the packed-sublane multiple and clamped to the data actually present."""
    rows = budget_bytes // max(1, 4 * d)
    rows = max(sublane_mult, (rows // sublane_mult) * sublane_mult)
    return min(rows, _round_up(max(n_rows, 1), sublane_mult))


# ----------------------------------------------------------------------------
# Pallas kernels
# ----------------------------------------------------------------------------
def _stats_kernel(x_ref, out_ref, acc_ref, *, tile_rows, tiles_per_partial,
                  n_valid, d, needs_row_mask):
    """Per-feature reductions over the row axis.

    grid = (num_partials [parallel], tiles_per_partial [arbitrary]).
    Accumulates per-sublane (8, D) partials for each statistic into a (5, 8, D)
    VMEM scratch (pure VPU work on full vregs); writes the output slab only on
    the last inner step of each partial.  The 8->1 cross-sublane reduce and the
    merge across partials happen in the O(D) JAX glue.
    """
    p = pl.program_id(0)
    t = pl.program_id(1)

    @pl.when(t == 0)
    def _init():
        acc_ref[_SUM] = jnp.zeros((8, d), jnp.float32)
        acc_ref[_SUMSQ] = jnp.zeros((8, d), jnp.float32)
        acc_ref[_MIN] = jnp.full((8, d), jnp.inf, jnp.float32)
        acc_ref[_MAX] = jnp.full((8, d), -jnp.inf, jnp.float32)
        acc_ref[_NOTOH] = jnp.zeros((8, d), jnp.float32)

    r = tile_rows // 8

    def accum(valid):
        xb = x_ref[...].astype(jnp.float32)            # (tile_rows, d)
        sq = xb * xb
        # |x*(x^2-1)| == 0  <=>  x in {-1, 0, 1}  (exact in fp32; reuses sq).
        u = jnp.abs(xb * (sq - 1.0))
        if valid is None:
            xs, ss, xmn, xmx = xb, sq, xb, xb
        else:
            xs = jnp.where(valid, xb, 0.0)
            ss = jnp.where(valid, sq, 0.0)
            u = jnp.where(valid, u, 0.0)
            xmn = jnp.where(valid, xb, jnp.inf)
            xmx = jnp.where(valid, xb, -jnp.inf)
        # Per-sublane partial reductions: elementwise adds/min/max across the
        # (tile_rows // 8) row blocks — no cross-sublane (XLU) work per tile.
        acc_ref[_SUM] += jnp.sum(xs.reshape(r, 8, d), axis=0)
        acc_ref[_SUMSQ] += jnp.sum(ss.reshape(r, 8, d), axis=0)
        acc_ref[_MIN] = jnp.minimum(acc_ref[_MIN],
                                    jnp.min(xmn.reshape(r, 8, d), axis=0))
        acc_ref[_MAX] = jnp.maximum(acc_ref[_MAX],
                                    jnp.max(xmx.reshape(r, 8, d), axis=0))
        acc_ref[_NOTOH] = jnp.maximum(acc_ref[_NOTOH],
                                      jnp.max(u.reshape(r, 8, d), axis=0))

    if needs_row_mask:
        # Only the ragged (or fully out-of-range, when the 2-partial split does
        # not divide evenly) tile pays for the mask; interior tiles take the
        # clean path at runtime via pl.when.
        row0 = (p * tiles_per_partial + t) * tile_rows
        is_ragged = row0 + tile_rows > n_valid

        @pl.when(jnp.logical_not(is_ragged))
        def _clean():
            accum(None)

        @pl.when(is_ragged)
        def _masked():
            gid = row0 + lax.broadcasted_iota(jnp.int32, (tile_rows, d), 0)
            accum(gid < n_valid)
    else:
        accum(None)

    @pl.when(t == pl.num_programs(1) - 1)
    def _flush():
        out_ref[...] = acc_ref[...]


def _norm_kernel(x_ref, stats_ref, o_ref):
    """(x - mean) * inv_std; stats_ref is (2, D): row 0 = mean, row 1 = inv_std
    (= 1/sqrt(var_fix + 1e-8), hoisted once in the JAX glue)."""
    x = x_ref[...].astype(jnp.float32)
    mu = stats_ref[0:1, :]
    inv = stats_ref[1:2, :]
    o_ref[...] = ((x - mu) * inv).astype(o_ref.dtype)


# ----------------------------------------------------------------------------
# pallas_call wrappers
# ----------------------------------------------------------------------------
def _batch_stats(x2d, tile_rows, num_partials, vmem_limit):
    n, d = x2d.shape
    n_tiles = int(pl.cdiv(n, tile_rows))
    num_partials = max(1, min(int(num_partials), n_tiles))
    tiles_per_partial = int(pl.cdiv(n_tiles, num_partials))
    needs_row_mask = (n % tile_rows != 0) or (
        num_partials * tiles_per_partial != n_tiles)

    kernel = functools.partial(
        _stats_kernel, tile_rows=tile_rows, tiles_per_partial=tiles_per_partial,
        n_valid=n, d=d, needs_row_mask=needs_row_mask)

    def x_index(p, t):
        # Clamp so a fully out-of-range tile of the last partial still DMAs a
        # valid block; the kernel masks its rows to neutral values.
        return (jnp.minimum(p * tiles_per_partial + t, n_tiles - 1), 0)

    cost = pl.CostEstimate(
        flops=8 * n * d, transcendentals=0,
        bytes_accessed=n * d * x2d.dtype.itemsize + num_partials * 5 * 8 * d * 4)

    return pl.pallas_call(
        kernel,
        out_shape=jax.ShapeDtypeStruct((num_partials, 5, 8, d), jnp.float32),
        grid=(num_partials, tiles_per_partial),
        in_specs=[pl.BlockSpec((tile_rows, d), x_index)],
        out_specs=pl.BlockSpec((None, 5, 8, d), lambda p, t: (p, 0, 0, 0)),
        scratch_shapes=[pltpu.VMEM((5, 8, d), jnp.float32)],
        compiler_params=pltpu.CompilerParams(
            dimension_semantics=("parallel", "arbitrary"),
            vmem_limit_bytes=vmem_limit),
        cost_estimate=cost,
    )(x2d)


def _normalize(x2d, mean_inv, tile_rows, out_dtype, vmem_limit):
    n, d = x2d.shape
    n_tiles = int(pl.cdiv(n, tile_rows))
    cost = pl.CostEstimate(
        flops=2 * n * d, transcendentals=0,
        bytes_accessed=n * d * (x2d.dtype.itemsize
                                + jnp.dtype(out_dtype).itemsize) + 2 * d * 4)
    return pl.pallas_call(
        _norm_kernel,
        out_shape=jax.ShapeDtypeStruct((n, d), out_dtype),
        grid=(n_tiles,),
        in_specs=[pl.BlockSpec((tile_rows, d), lambda i: (i, 0)),
                  pl.BlockSpec((2, d), lambda i: (0, 0))],
        out_specs=pl.BlockSpec((tile_rows, d), lambda i: (i, 0)),
        compiler_params=pltpu.CompilerParams(
            dimension_semantics=("parallel",),
            vmem_limit_bytes=vmem_limit),
        cost_estimate=cost,
    )(x2d, mean_inv)


# ----------------------------------------------------------------------------
# Module state + forward (functional equivalent of DynamicNormFix.forward)
# ----------------------------------------------------------------------------
def init_state(input_size):
    """Deterministic __init__ of DynamicNormFix's buffers."""
    return dict(
        mean=jnp.zeros((input_size,), jnp.float32),
        var=jnp.ones((input_size,), jnp.float32),
        var_fix=jnp.ones((input_size,), jnp.float32),
        min=jnp.full((input_size,), jnp.inf, jnp.float32),    # ones + inf
        max=jnp.full((input_size,), -jnp.inf, jnp.float32),   # ones - inf
        n_sample=jnp.zeros((1,), jnp.int32),
        one_hot_filter=jnp.ones((input_size,), jnp.bool_),
        patience=jnp.array(1000, jnp.int32),
    )


def dynamic_norm_fix_forward(x, state, training=True, freeze=False,
                             exclude_one_hot=True, get_mu_var=False,
                             tile_rows=None):
    # TODO(synk): exclude_nan row filtering (dynamic-shape boolean row mask) has no
    # clean static-shape Pallas equivalent; the exclude_nan=False path is implemented.
    d = x.shape[-1]
    x2d = x.reshape(-1, d)
    n = x2d.shape[0]

    vmem_limit, stats_budget, norm_budget, num_partials = _tpu_generation_params()
    sub = _sublane_multiple(x2d.dtype)
    if tile_rows is not None:
        stats_rows = norm_rows = max(sub, _round_up(int(tile_rows), sub))
    else:
        stats_rows = _choose_tile_rows(n, d, stats_budget, sub)
        norm_rows = _choose_tile_rows(n, d, norm_budget, sub)

    new_state = dict(state)
    if training and not freeze:
        stats = _batch_stats(x2d, stats_rows, num_partials, vmem_limit)
        # Merge partials and the 8 per-sublane lanes in O(D) glue.
        s = jnp.sum(stats[:, _SUM], axis=(0, 1))
        ss = jnp.sum(stats[:, _SUMSQ], axis=(0, 1))
        bmin = jnp.min(stats[:, _MIN], axis=(0, 1))
        bmax = jnp.max(stats[:, _MAX], axis=(0, 1))
        notoh = jnp.max(stats[:, _NOTOH], axis=(0, 1)) > 0.0

        bs = jnp.float32(n)
        batch_mean = s / bs
        # torch.var(unbiased=False); clamp >= 0 against f32 cancellation.
        batch_var = jnp.maximum(ss / bs - batch_mean * batch_mean, 0.0)

        n_old = state['n_sample'][0].astype(jnp.float32)
        tot = n_old + bs
        delta = batch_mean - state['mean']
        new_mean = state['mean'] + delta * bs / tot
        m_a = state['var'] * n_old
        m_b = batch_var * bs
        m2 = m_a + m_b + delta * delta * n_old * bs / tot
        new_var = m2 / tot

        if exclude_one_hot:
            ohf = state['one_hot_filter'] & jnp.logical_not(notoh)
            mean_upd = jnp.where(ohf, state['mean'], new_mean)
            var_upd = jnp.where(ohf, state['var'], new_var)
        else:
            ohf = state['one_hot_filter']
            mean_upd, var_upd = new_mean, new_var

        in_patience = state['patience'] > 0
        max_keep = jnp.maximum(bmax, state['max'])
        min_keep = jnp.minimum(bmin, state['min'])
        max_decay = state['max'] + (max_keep - state['max']) * bs / tot
        min_decay = state['min'] + (min_keep - state['min']) * bs / tot
        max_upd = jnp.where(in_patience, max_keep, max_decay)
        min_upd = jnp.where(in_patience, min_keep, min_decay)
        patience_upd = jnp.where(in_patience, state['patience'] - 1,
                                 state['patience'])

        dm = jnp.maximum(max_upd - mean_upd, mean_upd - min_upd)
        var2 = (dm / T2) ** 2
        leak = TD * var_upd + var2
        new_var_fix = jnp.maximum(var_upd, leak)
        var_fix_upd = (jnp.where(ohf, state['var_fix'], new_var_fix)
                       if exclude_one_hot else new_var_fix)

        new_state.update(
            mean=mean_upd, var=var_upd, var_fix=var_fix_upd,
            min=min_upd, max=max_upd,
            n_sample=(state['n_sample'] + jnp.int32(n)),
            one_hot_filter=ohf, patience=patience_upd,
        )

    if get_mu_var:
        return (new_state['mean'], new_state['var_fix']), new_state

    # Hoist the reciprocal sqrt: O(D) work done once, stacked with mean into a
    # single (2, D) constant-block input for the normalize pass.
    inv_std = 1.0 / jnp.sqrt(new_state['var_fix'] + 1e-8)
    mean_inv = jnp.stack([new_state['mean'], inv_std], axis=0)

    out_dtype = jnp.promote_types(x.dtype, jnp.float32)
    out2d = _normalize(x2d, mean_inv, norm_rows, out_dtype, vmem_limit)
    return out2d.reshape(x.shape), new_state


# ----------------------------------------------------------------------------
# Pure-JAX reference (mirrors the PyTorch math) for verification
# ----------------------------------------------------------------------------
def _reference_forward(x, state, exclude_one_hot=True):
    d = x.shape[-1]
    x2d = x.reshape(-1, d).astype(jnp.float32)
    n = x2d.shape[0]
    bs = jnp.float32(n)

    bm = x2d.mean(0)
    bv = x2d.var(0)
    n_old = state['n_sample'][0].astype(jnp.float32)
    tot = n_old + bs
    delta = bm - state['mean']
    new_mean = state['mean'] + delta * bs / tot
    m2 = state['var'] * n_old + bv * bs + delta * delta * n_old * bs / tot
    new_var = m2 / tot
    notoh = jnp.any((x2d != 0.0) & (x2d != 1.0) & (x2d != -1.0), axis=0)
    ohf = state['one_hot_filter'] & jnp.logical_not(notoh)
    mean_u = jnp.where(ohf, state['mean'], new_mean)
    var_u = jnp.where(ohf, state['var'], new_var)
    max_u = jnp.maximum(x2d.max(0), state['max'])
    min_u = jnp.minimum(x2d.min(0), state['min'])
    dm = jnp.maximum(max_u - mean_u, mean_u - min_u)
    leak = TD * var_u + (dm / T2) ** 2
    new_var_fix = jnp.maximum(var_u, leak)
    var_fix_u = jnp.where(ohf, state['var_fix'], new_var_fix)
    return (x - mean_u) / jnp.sqrt(var_fix_u + 1e-8)


# ----------------------------------------------------------------------------
if __name__ == "__main__":
    key = jax.random.PRNGKey(0)
    batch, seq, hidden = 2, 8, 32          # input_size = 32, 16 flattened rows
    x = jax.random.normal(key, (batch, seq, hidden), dtype=jnp.float32)

    # Training step (16 rows -> single tile, no ragged mask).
    state = init_state(hidden)
    out, new_state = dynamic_norm_fix_forward(
        x, state, training=True, freeze=False, exclude_one_hot=True)
    out = jax.block_until_ready(out)
    ref = _reference_forward(x, state, exclude_one_hot=True)
    assert out.shape == x.shape
    assert out.dtype == jnp.promote_types(x.dtype, jnp.float32)
    assert jnp.allclose(out, ref, rtol=1e-4, atol=1e-4), "mismatch vs reference"
    assert int(new_state['n_sample'][0]) == batch * seq

    # Odd row count (15 rows): exercises the ragged-last-tile in-kernel row mask
    # and the discarded out-of-bounds rows of the normalize output block.
    x2 = jax.random.normal(jax.random.PRNGKey(1), (3, 5, hidden), dtype=jnp.float32)
    state2 = init_state(hidden)
    out2, st2 = dynamic_norm_fix_forward(x2, state2, training=True)
    out2 = jax.block_until_ready(out2)
    ref2 = _reference_forward(x2, state2)
    assert jnp.allclose(out2, ref2, rtol=1e-4, atol=1e-4), "mismatch (masked tail)"
    assert int(st2['n_sample'][0]) == 15

    # Frozen / eval path: normalize with existing running stats, no state update.
    out3, _ = dynamic_norm_fix_forward(x, st2, training=False)
    out3 = jax.block_until_ready(out3)
    ref3 = (x - st2['mean']) / jnp.sqrt(st2['var_fix'] + 1e-8)
    assert jnp.allclose(out3, ref3, rtol=1e-4, atol=1e-4), "mismatch (eval path)"

    print("KERNEL_OK")
</pallas_src>

<mosaic_0001>
module attributes {stable_mosaic.version = 11 : i64} {
  func.func @_stats_kernel(%arg0: i32, %arg1: i32, %arg2: memref<16x32xf32, #tpu.memory_space<vmem>>, %arg3: memref<1x5x8x32xf32, #tpu.memory_space<vmem>>, %arg4: memref<5x8x32xf32, #tpu.memory_space<vmem>>) attributes {dimension_semantics = [#tpu.dimension_semantics<parallel>, #tpu.dimension_semantics<arbitrary>], iteration_bounds = array<i64: 1, 1>, scalar_prefetch = 0 : i64, scratch_operands = 1 : i64, tpu.core_type = #tpu.core_type<tc>, window_params = [{transform_indices = @transform_0, window_bounds = array<i64: 16, 32>}, {transform_indices = @transform_1, window_bounds = array<i64: 1, 5, 8, 32>}]} {
    %c0_i32 = arith.constant 0 : i32
    %0 = arith.cmpi eq, %arg1, %c0_i32 : i32
    %1 = arith.extui %0 : i1 to i32
    %c0_i32_0 = arith.constant 0 : i32
    %2 = arith.cmpi ne, %1, %c0_i32_0 : i32
    scf.if %2 {
      %cst_35 = arith.constant 0.000000e+00 : f32
      %52 = vector.broadcast %cst_35 : f32 to vector<8x32xf32>
      %c0_36 = arith.constant 0 : index
      %c0_37 = arith.constant 0 : index
      %c0_38 = arith.constant 0 : index
      %53 = vector.load %arg4[%c0_36, %c0_37, %c0_38] : memref<5x8x32xf32, #tpu.memory_space<vmem>>, vector<1x8x32xf32>
      %54 = vector.shape_cast %53 : vector<1x8x32xf32> to vector<8x32xf32>
      %55 = vector.shape_cast %52 : vector<8x32xf32> to vector<1x8x32xf32>
      tpu.vector_store %arg4[%c0_36, %c0_37, %c0_38], %55 {strides = array<i32>} : memref<5x8x32xf32, #tpu.memory_space<vmem>>, vector<1x8x32xf32>,
      %cst_39 = arith.constant 0.000000e+00 : f32
      %56 = vector.broadcast %cst_39 : f32 to vector<8x32xf32>
      %c1_40 = arith.constant 1 : index
      %c0_41 = arith.constant 0 : index
      %c0_42 = arith.constant 0 : index
      %57 = vector.load %arg4[%c1_40, %c0_41, %c0_42] : memref<5x8x32xf32, #tpu.memory_space<vmem>>, vector<1x8x32xf32>
      %58 = vector.shape_cast %57 : vector<1x8x32xf32> to vector<8x32xf32>
      %59 = vector.shape_cast %56 : vector<8x32xf32> to vector<1x8x32xf32>
      tpu.vector_store %arg4[%c1_40, %c0_41, %c0_42], %59 {strides = array<i32>} : memref<5x8x32xf32, #tpu.memory_space<vmem>>, vector<1x8x32xf32>,
      %cst_43 = arith.constant 0x7F800000 : f32
      %60 = vector.broadcast %cst_43 : f32 to vector<8x32xf32>
      %c2_44 = arith.constant 2 : index
      %c0_45 = arith.constant 0 : index
      %c0_46 = arith.constant 0 : index
      %61 = vector.load %arg4[%c2_44, %c0_45, %c0_46] : memref<5x8x32xf32, #tpu.memory_space<vmem>>, vector<1x8x32xf32>
      %62 = vector.shape_cast %61 : vector<1x8x32xf32> to vector<8x32xf32>
      %63 = vector.shape_cast %60 : vector<8x32xf32> to vector<1x8x32xf32>
      tpu.vector_store %arg4[%c2_44, %c0_45, %c0_46], %63 {strides = array<i32>} : memref<5x8x32xf32, #tpu.memory_space<vmem>>, vector<1x8x32xf32>,
      %cst_47 = arith.constant 0xFF800000 : f32
      %64 = vector.broadcast %cst_47 : f32 to vector<8x32xf32>
      %c3_48 = arith.constant 3 : index
      %c0_49 = arith.constant 0 : index
      %c0_50 = arith.constant 0 : index
      %65 = vector.load %arg4[%c3_48, %c0_49, %c0_50] : memref<5x8x32xf32, #tpu.memory_space<vmem>>, vector<1x8x32xf32>
      %66 = vector.shape_cast %65 : vector<1x8x32xf32> to vector<8x32xf32>
      %67 = vector.shape_cast %64 : vector<8x32xf32> to vector<1x8x32xf32>
      tpu.vector_store %arg4[%c3_48, %c0_49, %c0_50], %67 {strides = array<i32>} : memref<5x8x32xf32, #tpu.memory_space<vmem>>, vector<1x8x32xf32>,
      %cst_51 = arith.constant 0.000000e+00 : f32
      %68 = vector.broadcast %cst_51 : f32 to vector<8x32xf32>
      %c4_52 = arith.constant 4 : index
      %c0_53 = arith.constant 0 : index
      %c0_54 = arith.constant 0 : index
      %69 = vector.load %arg4[%c4_52, %c0_53, %c0_54] : memref<5x8x32xf32, #tpu.memory_space<vmem>>, vector<1x8x32xf32>
      %70 = vector.shape_cast %69 : vector<1x8x32xf32> to vector<8x32xf32>
      %71 = vector.shape_cast %68 : vector<8x32xf32> to vector<1x8x32xf32>
      tpu.vector_store %arg4[%c4_52, %c0_53, %c0_54], %71 {strides = array<i32>} : memref<5x8x32xf32, #tpu.memory_space<vmem>>, vector<1x8x32xf32>,
    } else {
    }
    %c0 = arith.constant 0 : index
    %c0_1 = arith.constant 0 : index
    %3 = vector.load %arg2[%c0, %c0_1] : memref<16x32xf32, #tpu.memory_space<vmem>>, vector<16x32xf32>
    %4 = arith.mulf %3, %3 : vector<16x32xf32>
    %cst = arith.constant 1.000000e+00 : f32
    %5 = vector.broadcast %cst : f32 to vector<16x32xf32>
    %6 = arith.subf %4, %5 : vector<16x32xf32>
    %7 = arith.mulf %3, %6 : vector<16x32xf32>
    %8 = math.absf %7 : vector<16x32xf32>
    %c0_2 = arith.constant 0 : index
    %c0_3 = arith.constant 0 : index
    %c0_4 = arith.constant 0 : index
    %9 = vector.load %arg4[%c0_2, %c0_3, %c0_4] : memref<5x8x32xf32, #tpu.memory_space<vmem>>, vector<1x8x32xf32>
    %10 = vector.shape_cast %9 : vector<1x8x32xf32> to vector<8x32xf32>
    %11 = vector.shape_cast %3 : vector<16x32xf32> to vector<2x8x32xf32>
    %cst_5 = arith.constant dense<0.000000e+00> : vector<8x32xf32>
    %12 = vector.multi_reduction <add>, %11, %cst_5 [0] : vector<2x8x32xf32> to vector<8x32xf32>
    %13 = arith.addf %10, %12 : vector<8x32xf32>
    %c0_6 = arith.constant 0 : index
    %c0_7 = arith.constant 0 : index
    %c0_8 = arith.constant 0 : index
    %14 = vector.load %arg4[%c0_6, %c0_7, %c0_8] : memref<5x8x32xf32, #tpu.memory_space<vmem>>, vector<1x8x32xf32>
    %15 = vector.shape_cast %14 : vector<1x8x32xf32> to vector<8x32xf32>
    %16 = vector.shape_cast %13 : vector<8x32xf32> to vector<1x8x32xf32>
    tpu.vector_store %arg4[%c0_6, %c0_7, %c0_8], %16 {strides = array<i32>} : memref<5x8x32xf32, #tpu.memory_space<vmem>>, vector<1x8x32xf32>,
    %c1 = arith.constant 1 : index
    %c0_9 = arith.constant 0 : index
    %c0_10 = arith.constant 0 : index
    %17 = vector.load %arg4[%c1, %c0_9, %c0_10] : memref<5x8x32xf32, #tpu.memory_space<vmem>>, vector<1x8x32xf32>
    %18 = vector.shape_cast %17 : vector<1x8x32xf32> to vector<8x32xf32>
    %19 = vector.shape_cast %4 : vector<16x32xf32> to vector<2x8x32xf32>
    %cst_11 = arith.constant dense<0.000000e+00> : vector<8x32xf32>
    %20 = vector.multi_reduction <add>, %19, %cst_11 [0] : vector<2x8x32xf32> to vector<8x32xf32>
    %21 = arith.addf %18, %20 : vector<8x32xf32>
    %c1_12 = arith.constant 1 : index
    %c0_13 = arith.constant 0 : index
    %c0_14 = arith.constant 0 : index
    %22 = vector.load %arg4[%c1_12, %c0_13, %c0_14] : memref<5x8x32xf32, #tpu.memory_space<vmem>>, vector<1x8x32xf32>
    %23 = vector.shape_cast %22 : vector<1x8x32xf32> to vector<8x32xf32>
    %24 = vector.shape_cast %21 : vector<8x32xf32> to vector<1x8x32xf32>
    tpu.vector_store %arg4[%c1_12, %c0_13, %c0_14], %24 {strides = array<i32>} : memref<5x8x32xf32, #tpu.memory_space<vmem>>, vector<1x8x32xf32>,
    %c2 = arith.constant 2 : index
    %c0_15 = arith.constant 0 : index
    %c0_16 = arith.constant 0 : index
    %25 = vector.load %arg4[%c2, %c0_15, %c0_16] : memref<5x8x32xf32, #tpu.memory_space<vmem>>, vector<1x8x32xf32>
    %26 = vector.shape_cast %25 : vector<1x8x32xf32> to vector<8x32xf32>
    %27 = vector.shape_cast %3 : vector<16x32xf32> to vector<2x8x32xf32>
    %cst_17 = arith.constant dense<0x7F800000> : vector<8x32xf32>
    %28 = vector.multi_reduction <minimumf>, %27, %cst_17 [0] : vector<2x8x32xf32> to vector<8x32xf32>
    %29 = arith.minimumf %26, %28 : vector<8x32xf32>
    %c2_18 = arith.constant 2 : index
    %c0_19 = arith.constant 0 : index
    %c0_20 = arith.constant 0 : index
    %30 = vector.load %arg4[%c2_18, %c0_19, %c0_20] : memref<5x8x32xf32, #tpu.memory_space<vmem>>, vector<1x8x32xf32>
    %31 = vector.shape_cast %30 : vector<1x8x32xf32> to vector<8x32xf32>
    %32 = vector.shape_cast %29 : vector<8x32xf32> to vector<1x8x32xf32>
    tpu.vector_store %arg4[%c2_18, %c0_19, %c0_20], %32 {strides = array<i32>} : memref<5x8x32xf32, #tpu.memory_space<vmem>>, vector<1x8x32xf32>,
    %c3 = arith.constant 3 : index
    %c0_21 = arith.constant 0 : index
    %c0_22 = arith.constant 0 : index
    %33 = vector.load %arg4[%c3, %c0_21, %c0_22] : memref<5x8x32xf32, #tpu.memory_space<vmem>>, vector<1x8x32xf32>
    %34 = vector.shape_cast %33 : vector<1x8x32xf32> to vector<8x32xf32>
    %35 = vector.shape_cast %3 : vector<16x32xf32> to vector<2x8x32xf32>
    %cst_23 = arith.constant dense<0xFF800000> : vector<8x32xf32>
    %36 = vector.multi_reduction <maximumf>, %35, %cst_23 [0] : vector<2x8x32xf32> to vector<8x32xf32>
    %37 = arith.maximumf %34, %36 : vector<8x32xf32>
    %c3_24 = arith.constant 3 : index
    %c0_25 = arith.constant 0 : index
    %c0_26 = arith.constant 0 : index
    %38 = vector.load %arg4[%c3_24, %c0_25, %c0_26] : memref<5x8x32xf32, #tpu.memory_space<vmem>>, vector<1x8x32xf32>
    %39 = vector.shape_cast %38 : vector<1x8x32xf32> to vector<8x32xf32>
    %40 = vector.shape_cast %37 : vector<8x32xf32> to vector<1x8x32xf32>
    tpu.vector_store %arg4[%c3_24, %c0_25, %c0_26], %40 {strides = array<i32>} : memref<5x8x32xf32, #tpu.memory_space<vmem>>, vector<1x8x32xf32>,
    %c4 = arith.constant 4 : index
    %c0_27 = arith.constant 0 : index
    %c0_28 = arith.constant 0 : index
    %41 = vector.load %arg4[%c4, %c0_27, %c0_28] : memref<5x8x32xf32, #tpu.memory_space<vmem>>, vector<1x8x32xf32>
    %42 = vector.shape_cast %41 : vector<1x8x32xf32> to vector<8x32xf32>
    %43 = vector.shape_cast %8 : vector<16x32xf32> to vector<2x8x32xf32>
    %cst_29 = arith.constant dense<0xFF800000> : vector<8x32xf32>
    %44 = vector.multi_reduction <maximumf>, %43, %cst_29 [0] : vector<2x8x32xf32> to vector<8x32xf32>
    %45 = arith.maximumf %42, %44 : vector<8x32xf32>
    %c4_30 = arith.constant 4 : index
    %c0_31 = arith.constant 0 : index
    %c0_32 = arith.constant 0 : index
    %46 = vector.load %arg4[%c4_30, %c0_31, %c0_32] : memref<5x8x32xf32, #tpu.memory_space<vmem>>, vector<1x8x32xf32>
    %47 = vector.shape_cast %46 : vector<1x8x32xf32> to vector<8x32xf32>
    %48 = vector.shape_cast %45 : vector<8x32xf32> to vector<1x8x32xf32>
    tpu.vector_store %arg4[%c4_30, %c0_31, %c0_32], %48 {strides = array<i32>} : memref<5x8x32xf32, #tpu.memory_space<vmem>>, vector<1x8x32xf32>,
    %c0_i32_33 = arith.constant 0 : i32
    %49 = arith.cmpi eq, %arg1, %c0_i32_33 : i32
    %50 = arith.extui %49 : i1 to i32
    %c0_i32_34 = arith.constant 0 : i32
    %51 = arith.cmpi ne, %50, %c0_i32_34 : i32
    scf.if %51 {
      %c0_35 = arith.constant 0 : index
      %c0_36 = arith.constant 0 : index
      %c0_37 = arith.constant 0 : index
      %52 = vector.load %arg4[%c0_35, %c0_36, %c0_37] : memref<5x8x32xf32, #tpu.memory_space<vmem>>, vector<5x8x32xf32>
      %c0_38 = arith.constant 0 : index
      %c0_39 = arith.constant 0 : index
      %c0_40 = arith.constant 0 : index
      %c0_41 = arith.constant 0 : index
      %53 = vector.load %arg3[%c0_38, %c0_39, %c0_40, %c0_41] : memref<1x5x8x32xf32, #tpu.memory_space<vmem>>, vector<1x5x8x32xf32>
      %54 = vector.shape_cast %53 : vector<1x5x8x32xf32> to vector<5x8x32xf32>
      %55 = vector.shape_cast %52 : vector<5x8x32xf32> to vector<1x5x8x32xf32>
      tpu.vector_store %arg3[%c0_38, %c0_39, %c0_40, %c0_41], %55 {strides = array<i32>} : memref<1x5x8x32xf32, #tpu.memory_space<vmem>>, vector<1x5x8x32xf32>,
    } else {
    }
    return
  }
  func.func @transform_0(%arg0: i32, %arg1: i32) -> (i32, i32) {
    %c1_i32 = arith.constant 1 : i32
    %0 = arith.muli %arg0, %c1_i32 : i32
    %1 = arith.addi %0, %arg1 : i32
    %c0_i32 = arith.constant 0 : i32
    %2 = arith.minsi %1, %c0_i32 : i32
    %c0_i32_0 = arith.constant 0 : i32
    %c0_i32_1 = arith.constant 0 : i32
    return %2, %c0_i32_0 : i32, i32
  }
  func.func @transform_1(%arg0: i32, %arg1: i32) -> (i32, i32, i32, i32) {
    %c0_i32 = arith.constant 0 : i32
    %c0_i32_0 = arith.constant 0 : i32
    %c0_i32_1 = arith.constant 0 : i32
    %c0_i32_2 = arith.constant 0 : i32
    return %arg0, %c0_i32, %c0_i32_0, %c0_i32_1 : i32, i32, i32, i32
  }
}

</mosaic_0001>

<bundles_post_ra>
// kernel: tpu_custom_call.1
= control target key start
LH: loop header
LB: loop body
LE: loop exit
PB: predicated region body
PF: predicated region fallthrough
CT: control target
= control target key end

     0   :  { %6 = vsyncpa [#allocation4], 0  ;;  %s253_s0 = inlined_call_operand.hbm [shape: f32[16,32], index: 0, kind: input, shape index: {}]   ;;  %s254_s1 = inlined_call_operand.hbm [shape: f32[1,5,8,32], index: 1, kind: output, shape index: {}]  }
   0x1   :  { %7 = vsyncpa [#allocation5], 0  ;;  %s181_s6 = smov [#allocation3]   ;;  %s133_s10 = scalar_lea.hbm %s253_s0, 256 }
   0x2   :  { %s19_s7 = sshll.u32 %s181_s6, 4  ;;  %p134_p0 = scmp.ne.s32.totalorder %s253_s0, %s133_s10  ;;  %s20_s7 = int_to_ptr.vmem [resolvable:$true] %s19_s7 }
   0x3   :  { %p137_p1 = scmp.lt.u32.totalorder %s133_s10, %s253_s0 }
   0x5   :  { %p139_p2 = pnand %p137_p1, %p134_p0 }
   0x7   :  { %142 = shalt.err (!%p139_p2)
}
   0x8   :  { %s143_s15 = scalar_lea.vmem %s20_s7, 256  ;;  %p148_p4 = scmp.lt.s32.totalorder %s20_s7, %s20_s7 }
   0x9   :  { %p144_p3 = scmp.ne.s32.totalorder %s20_s7, %s143_s15  ;;  %p149_p5 = scmp.lt.s32.totalorder %s143_s15, %s143_s15 }
   0xb   :  { %p150_p6 = por %p149_p5, %p148_p4 }
   0xd   :  { %p151_p7 = pnand %p150_p6, %p144_p3 }
   0xf   :  { %154 = shalt.err (!%p151_p7)
}
  0x10   :  { %s182_s16 = smov 128   ;;  %s183_s17 = smov 8  }
  0x11   :  { %25 = dma.hbm_to_vmem [thread:$0]  %s253_s0, 256, %s20_s7, [#allocation4], %s182_s16, %s182_s16, %s183_s17  }
  0x12   :  { %177 = dma.done.wait [#allocation4], 256  }
  0x13   :  { %178 = vsyncadd [#allocation4], 4294967040  ;;  %vm37_vm0 = vcmask 261120   ;;  %v184_v0 = vmov 0.0   ;;  %v185_v1 = vmov inf   ;;  %v186_v2 = vmov -inf  }
  0x14   :  { %38 = vst.msk [vmem:[#allocation2] sm:$0xff] %vm37_vm0, %v184_v0  ;;  %40 = vst.msk [vmem:[#allocation2 + $0x8] sm:$0xff] %vm37_vm0, %v184_v0  ;;  %v47_v3 = vld [vmem:[#allocation3] sm:$0xff]  ;;  %v48_v4 = vld [vmem:[#allocation3 + $0x8] sm:$0xff]  ;;  %s187_s0 = smov [#allocation6]  }
  0x15   :  { %46 = vst.msk [vmem:[#allocation2 + $0x20] sm:$0xff] %vm37_vm0, %v184_v0  ;;  %42 = vst.msk [vmem:[#allocation2 + $0x10] sm:$0xff] %vm37_vm0, %v185_v1  ;;  %v59_v6 = vsel %vm37_vm0, %v47_v3, 0.0  ;;  %v60_v7 = vsel %vm37_vm0, %v48_v4, 0.0  ;;  %v49_v8 = vmul.f32 %v47_v3, %v47_v3  ;;  %v50_v9 = vmul.f32 %v48_v4, %v48_v4  ;;  %s110_s20 = sshll.u32 %s187_s0, 4  ;;  %s111_s20 = int_to_ptr.vmem [resolvable:$true] %s110_s20 }
  0x16   :  { %44 = vst.msk [vmem:[#allocation2 + $0x18] sm:$0xff] %vm37_vm0, %v186_v2  ;;  %v61_v10 = vadd.f32 %v60_v7, %v59_v6  ;;  %v73_v11 = vsel %vm37_vm0, %v47_v3, inf  ;;  %v74_v12 = vsel %vm37_vm0, %v48_v4, inf  ;;  %v80_v13 = vsel %vm37_vm0, %v47_v3, -inf  ;;  %s155_s21 = scalar_lea.vmem %s111_s20, 640  ;;  %p160_p9 = scmp.lt.s32.totalorder %s111_s20, %s111_s20 }
  0x17   :  { %v124_v14 = vadd.f32 -1.0, %v49_v8  ;;  %v125_v15 = vadd.f32 -1.0, %v50_v9  ;;  %v66_v17 = vsel %vm37_vm0, %v49_v8, 0.0  ;;  %v67_v18 = vsel %vm37_vm0, %v50_v9, 0.0  ;;  %p156_p8 = scmp.ne.s32.totalorder %s111_s20, %s155_s21  ;;  %p161_p10 = scmp.lt.s32.totalorder %s155_s21, %s155_s21 }
  0x18   :  { %v68_v21 = vadd.f32 %v67_v18, %v66_v17  ;;  %v75_v22 = vmin.f32 %v73_v11, %v74_v12  ;;  %v81_v24 = vsel %vm37_vm0, %v48_v4, -inf }
  0x19   :  { %v82_v25 = vmax.f32 %v80_v13, %v81_v24  ;;  %v53_v26 = vmul.f32 %v124_v14, %v47_v3  ;;  %v54_v27 = vmul.f32 %v125_v15, %v48_v4  ;;  %p162_p11 = por %p161_p10, %p160_p9 }
  0x1b   :  { %v57_v5 = vld [vmem:[#allocation2] sm:$0xff]  ;;  %v65_v16 = vld [vmem:[#allocation2 + $0x8] sm:$0xff]  ;;  %v55_v31 = vand.u32 2147483647, %v53_v26  ;;  %v56_v32 = vand.u32 2147483647, %v54_v27  ;;  %p163_p12 = pnand %p162_p11, %p156_p8 }
  0x1c   :  { %v72_v19 = vld [vmem:[#allocation2 + $0x10] sm:$0xff]  ;;  %v62_v20 = vadd.f32 %v61_v10, %v57_v5  ;;  %v69_v28 = vadd.f32 %v68_v21, %v65_v16  ;;  %v86_v33 = vld [vmem:[#allocation2 + $0x20] sm:$0xff] }
  0x1d   :  { %v79_v23 = vld [vmem:[#allocation2 + $0x18] sm:$0xff]  ;;  %v76_v29 = vmin.f32 %v72_v19, %v75_v22  ;;  %v87_v34 = vsel %vm37_vm0, %v55_v31, -inf  ;;  %v88_v35 = vsel %vm37_vm0, %v56_v32, -inf }
  0x1e   :  { %63 = vst.msk [vmem:[#allocation2] sm:$0xff] %vm37_vm0, %v62_v20  ;;  %v83_v30 = vmax.f32 %v79_v23, %v82_v25  ;;  %70 = vst.msk [vmem:[#allocation2 + $0x8] sm:$0xff] %vm37_vm0, %v69_v28  ;;  %v89_v36 = vmax.f32 %v87_v34, %v88_v35 }
  0x1f   :  { %77 = vst.msk [vmem:[#allocation2 + $0x10] sm:$0xff] %vm37_vm0, %v76_v29 }
  0x20   :  { %84 = vst.msk [vmem:[#allocation2 + $0x18] sm:$0xff] %vm37_vm0, %v83_v30  ;;  %v90_v37 = vmax.f32 %v86_v33, %v89_v36 }
  0x22   :  { %91 = vst.msk [vmem:[#allocation2 + $0x20] sm:$0xff] %vm37_vm0, %v90_v37 }
  0x25   :  { %v95_v38 = vld [vmem:[#allocation2] sm:$0xff]  ;;  %v96_v39 = vld [vmem:[#allocation2 + $0x8] sm:$0xff] }
  0x26   :  { %100 = vst.msk [vmem:[#allocation6] sm:$0xff] %vm37_vm0, %v95_v38  ;;  %v97_v40 = vld [vmem:[#allocation2 + $0x10] sm:$0xff]  ;;  %101 = vst.msk [vmem:[#allocation6 + $0x8] sm:$0xff] %vm37_vm0, %v96_v39 }
  0x27   :  { %102 = vst.msk [vmem:[#allocation6 + $0x10] sm:$0xff] %vm37_vm0, %v97_v40  ;;  %v98_v41 = vld [vmem:[#allocation2 + $0x18] sm:$0xff] }
  0x28   :  { %103 = vst.msk [vmem:[#allocation6 + $0x18] sm:$0xff] %vm37_vm0, %v98_v41 }
  0x29   :  { %v99_v42 = vld [vmem:[#allocation2 + $0x20] sm:$0xff] }
  0x2a   :  { %104 = vst.msk [vmem:[#allocation6 + $0x20] sm:$0xff] %vm37_vm0, %v99_v42 }
  0x2b   :  { %166 = shalt.err (!%p163_p12)
}
  0x2c   :  { %s167_s24 = scalar_lea.hbm %s254_s1, 640 }
  0x2d   :  { %p168_p13 = scmp.ne.s32.totalorder %s254_s1, %s167_s24  ;;  %p171_p0 = scmp.lt.u32.totalorder %s167_s24, %s254_s1 }
  0x2f   :  { %p173_p1 = pnand %p171_p0, %p168_p13 }
  0x31   :  { %176 = shalt.err (!%p173_p1)
}
  0x32   :  { %116 = dma.vmem_to_hbm [thread:$0]  %s111_s20, 640, %s254_s1, [#allocation5], %s182_s16, %s182_s16, %s183_s17  }
  0x33   :  { %179 = dma.done.wait [#allocation5], 640  }
  0x34   :  { %180 = vsyncadd [#allocation5], 4294966656 }
  0x35   :  { %120 = vsyncpa [#allocation4], 1 }
  0x36   :  { %121 = vsyncpa [#allocation5], 1 }

</bundles_post_ra>
